<compile_context>
chip_gen: v7x
topology: tpu7x:2x2x1
jax: 0.10.0
libtpu: 0.0.40
codegen_flags: <defaults>
</compile_context>

<pallas_src>
import functools

import jax
import jax.numpy as jnp
from jax.experimental import pallas as pl
from jax.experimental.pallas import tpu as pltpu


def _round_up(x, m):
    return (x + m - 1) // m * m


def _ce_kernel(tgt_ref, logits_ref, out_ref, m_scr, s_scr, t_scr, *,
               num_classes, tile_c):
    """One (row-tile i, class-tile k) step of online-logsumexp cross entropy."""
    k = pl.program_id(1)

    @pl.when(k == 0)
    def _init():
        m_scr[...] = jnp.full_like(m_scr, -jnp.inf)
        s_scr[...] = jnp.zeros_like(s_scr)
        t_scr[...] = jnp.zeros_like(t_scr)

    x = logits_ref[...]                                   # (TN, TC), native dtype
    tgt = tgt_ref[...]                                    # (TN, 1) int32

    # Global class index of each lane in this tile; mask lanes past the real C.
    col = tile_c * k + jax.lax.broadcasted_iota(jnp.int32, x.shape, 1)
    valid = col < num_classes

    # Row max over valid lanes (native dtype), merged into the running max (f32).
    xm = jnp.where(valid, x, -jnp.inf)                    # native dtype
    tile_max = jnp.max(xm, axis=-1, keepdims=True).astype(jnp.float32)
    m_prev = m_scr[...]                                   # (TN, 1) f32
    m_new = jnp.maximum(m_prev, tile_max)

    # Online exp-sum: rescale the old sum, add this tile's contribution (f32 acc).
    shifted = xm - m_new.astype(x.dtype)                  # masked lanes stay -inf
    p = jnp.exp(shifted.astype(jnp.float32))              # masked lanes -> 0
    s_scr[...] = jnp.exp(m_prev - m_new) * s_scr[...] + jnp.sum(
        p, axis=-1, keepdims=True)
    m_scr[...] = m_new

    # Accumulate the target-class logit via a lane-iota one-hot select.
    hit = jnp.logical_and(valid, col == tgt)
    t_scr[...] += jnp.sum(jnp.where(hit, x, 0).astype(jnp.float32),
                          axis=-1, keepdims=True)

    @pl.when(k == pl.num_programs(1) - 1)
    def _finalize():
        # per-example loss = logsumexp(logits) - logits[target]
        out_ref[...] = m_scr[...] + jnp.log(s_scr[...]) - t_scr[...]


def categorical_cross_entropy_loss(y_true, y_pred, *, tile_n=512, tile_c=2048):
    """y_true: (N,) int class indices; y_pred: (N, C) float logits.

    Returns scalar float32 loss == torch.mean(nn.CrossEntropyLoss()(y_pred, y_true)).
    """
    n, c = y_pred.shape
    targets = y_true.astype(jnp.int32).reshape(n, 1)

    # Row tile: multiple of 8 sublanes; class tile: full C or a multiple of 128.
    tn = _round_up(min(tile_n, n), 8)
    tc = c if c <= tile_c else _round_up(tile_c, 128)
    grid = (pl.cdiv(n, tn), pl.cdiv(c, tc))

    itemsize = jnp.dtype(y_pred.dtype).itemsize
    cost = pl.CostEstimate(
        flops=5 * n * c,                 # max/sub/exp-shift/sum/select (approx)
        transcendentals=n * c,           # one exp per logit
        bytes_accessed=n * c * itemsize + n * 4 + n * 4,
    )

    per_example = pl.pallas_call(
        functools.partial(_ce_kernel, num_classes=c, tile_c=tc),
        out_shape=jax.ShapeDtypeStruct((n, 1), jnp.float32),
        grid_spec=pltpu.PrefetchScalarGridSpec(
            num_scalar_prefetch=0,
            grid=grid,
            in_specs=[
                pl.BlockSpec((tn, 1), lambda i, k: (i, 0)),   # targets (resident over k)
                pl.BlockSpec((tn, tc), lambda i, k: (i, k)),  # logits tile
            ],
            out_specs=pl.BlockSpec((tn, 1), lambda i, k: (i, 0)),
            scratch_shapes=[
                pltpu.VMEM((tn, 1), jnp.float32),  # running max
                pltpu.VMEM((tn, 1), jnp.float32),  # running exp-sum
                pltpu.VMEM((tn, 1), jnp.float32),  # running target logit
            ],
        ),
        compiler_params=pltpu.CompilerParams(
            dimension_semantics=("parallel", "arbitrary"),
            vmem_limit_bytes=32 * 1024 * 1024,
        ),
        cost_estimate=cost,
    )(targets, y_pred)

    # Final mean over the true N happens here (keeps the row axis megacore-safe).
    return jnp.mean(per_example)


def _reference(y_true, y_pred):
    y32 = y_pred.astype(jnp.float32)
    lse = jax.nn.logsumexp(y32, axis=-1)
    tgt = jnp.take_along_axis(y32, y_true.astype(jnp.int32)[:, None], axis=-1)[:, 0]
    return jnp.mean(lse - tgt)


if __name__ == "__main__":
    key = jax.random.PRNGKey(0)
    k1, k2, k3, k4 = jax.random.split(key, 4)

    # Test 1: small shapes consistent with the module's typical use (batch=8, classes=32).
    n1, c1 = 8, 32
    y_pred1 = jax.random.normal(k1, (n1, c1), dtype=jnp.float32)
    y_true1 = jax.random.randint(k2, (n1,), 0, c1, dtype=jnp.int32)
    loss1 = jax.block_until_ready(categorical_cross_entropy_loss(y_true1, y_pred1))
    ref1 = _reference(y_true1, y_pred1)
    assert jnp.allclose(loss1, ref1, rtol=1e-5, atol=1e-5), (loss1, ref1)

    # Test 2: exercises row tiling, class tiling (online logsumexp) and edge-tile masking.
    n2, c2 = 400, 2600
    y_pred2 = jax.random.normal(k3, (n2, c2), dtype=jnp.float32)
    y_true2 = jax.random.randint(k4, (n2,), 0, c2, dtype=jnp.int32)
    loss2 = jax.block_until_ready(
        categorical_cross_entropy_loss(y_true2, y_pred2, tile_n=128, tile_c=1024))
    ref2 = _reference(y_true2, y_pred2)
    assert jnp.allclose(loss2, ref2, rtol=1e-5, atol=1e-5), (loss2, ref2)

    print("KERNEL_OK")
</pallas_src>

<mosaic_0001>
module attributes {stable_mosaic.version = 11 : i64} {
  func.func @_ce_kernel(%arg0: i32, %arg1: i32, %arg2: memref<8x1xi32, #tpu.memory_space<vmem>>, %arg3: memref<8x32xf32, #tpu.memory_space<vmem>>, %arg4: memref<8x1xf32, #tpu.memory_space<vmem>>, %arg5: memref<8x1xf32, #tpu.memory_space<vmem>>, %arg6: memref<8x1xf32, #tpu.memory_space<vmem>>, %arg7: memref<8x1xf32, #tpu.memory_space<vmem>>) attributes {dimension_semantics = [#tpu.dimension_semantics<parallel>, #tpu.dimension_semantics<arbitrary>], iteration_bounds = array<i64: 1, 1>, scalar_prefetch = 0 : i64, scratch_operands = 3 : i64, tpu.core_type = #tpu.core_type<tc>, window_params = [{transform_indices = @transform_0, window_bounds = array<i64: 8, 1>}, {transform_indices = @transform_1, window_bounds = array<i64: 8, 32>}, {transform_indices = @transform_2, window_bounds = array<i64: 8, 1>}]} {
    %c0_i32 = arith.constant 0 : i32
    %0 = arith.cmpi eq, %arg1, %c0_i32 : i32
    %1 = arith.extui %0 : i1 to i32
    %c0_i32_0 = arith.constant 0 : i32
    %2 = arith.cmpi ne, %1, %c0_i32_0 : i32
    scf.if %2 {
      %cst_23 = arith.constant 0xFF800000 : f32
      %43 = vector.broadcast %cst_23 : f32 to vector<8x1xf32>
      %c0_24 = arith.constant 0 : index
      %c0_25 = arith.constant 0 : index
      %44 = vector.load %arg5[%c0_24, %c0_25] : memref<8x1xf32, #tpu.memory_space<vmem>>, vector<8x1xf32>
      tpu.vector_store %arg5[%c0_24, %c0_25], %43 {strides = array<i32>} : memref<8x1xf32, #tpu.memory_space<vmem>>, vector<8x1xf32>,
      %cst_26 = arith.constant 0.000000e+00 : f32
      %45 = vector.broadcast %cst_26 : f32 to vector<8x1xf32>
      %c0_27 = arith.constant 0 : index
      %c0_28 = arith.constant 0 : index
      %46 = vector.load %arg6[%c0_27, %c0_28] : memref<8x1xf32, #tpu.memory_space<vmem>>, vector<8x1xf32>
      tpu.vector_store %arg6[%c0_27, %c0_28], %45 {strides = array<i32>} : memref<8x1xf32, #tpu.memory_space<vmem>>, vector<8x1xf32>,
      %cst_29 = arith.constant 0.000000e+00 : f32
      %47 = vector.broadcast %cst_29 : f32 to vector<8x1xf32>
      %c0_30 = arith.constant 0 : index
      %c0_31 = arith.constant 0 : index
      %48 = vector.load %arg7[%c0_30, %c0_31] : memref<8x1xf32, #tpu.memory_space<vmem>>, vector<8x1xf32>
      tpu.vector_store %arg7[%c0_30, %c0_31], %47 {strides = array<i32>} : memref<8x1xf32, #tpu.memory_space<vmem>>, vector<8x1xf32>,
    } else {
    }
    %c0 = arith.constant 0 : index
    %c0_1 = arith.constant 0 : index
    %3 = vector.load %arg3[%c0, %c0_1] : memref<8x32xf32, #tpu.memory_space<vmem>>, vector<8x32xf32>
    %c0_2 = arith.constant 0 : index
    %c0_3 = arith.constant 0 : index
    %4 = vector.load %arg2[%c0_2, %c0_3] : memref<8x1xi32, #tpu.memory_space<vmem>>, vector<8x1xi32>
    %c32_i32 = arith.constant 32 : i32
    %5 = arith.muli %c32_i32, %arg1 : i32
    %6 = tpu.iota {dimensions = array<i32: 1>} : vector<8x32xi32>
    %7 = vector.broadcast %5 : i32 to vector<8x32xi32>
    %8 = arith.addi %7, %6 : vector<8x32xi32>
    %c32_i32_4 = arith.constant 32 : i32
    %9 = vector.broadcast %c32_i32_4 : i32 to vector<8x32xi32>
    %10 = arith.cmpi slt, %8, %9 : vector<8x32xi32>
    %cst = arith.constant 0xFF800000 : f32
    %11 = vector.broadcast %cst : f32 to vector<8x32xf32>
    %12 = arith.select %10, %3, %11 : vector<8x32xi1>, vector<8x32xf32>
    %cst_5 = arith.constant dense<0xFF800000> : vector<8xf32>
    %13 = vector.multi_reduction <maximumf>, %12, %cst_5 [1] : vector<8x32xf32> to vector<8xf32>
    %14 = vector.shape_cast %13 : vector<8xf32> to vector<8x1xf32>
    %c0_6 = arith.constant 0 : index
    %c0_7 = arith.constant 0 : index
    %15 = vector.load %arg5[%c0_6, %c0_7] : memref<8x1xf32, #tpu.memory_space<vmem>>, vector<8x1xf32>
    %16 = arith.maximumf %15, %14 : vector<8x1xf32>
    %17 = vector.broadcast %16 : vector<8x1xf32> to vector<8x32xf32>
    %18 = arith.subf %12, %17 : vector<8x32xf32>
    %19 = math.exp %18 : vector<8x32xf32>
    %20 = arith.subf %15, %16 : vector<8x1xf32>
    %21 = math.exp %20 : vector<8x1xf32>
    %c0_8 = arith.constant 0 : index
    %c0_9 = arith.constant 0 : index
    %22 = vector.load %arg6[%c0_8, %c0_9] : memref<8x1xf32, #tpu.memory_space<vmem>>, vector<8x1xf32>
    %23 = arith.mulf %21, %22 : vector<8x1xf32>
    %cst_10 = arith.constant dense<0.000000e+00> : vector<8xf32>
    %24 = vector.multi_reduction <add>, %19, %cst_10 [1] : vector<8x32xf32> to vector<8xf32>
    %25 = vector.shape_cast %24 : vector<8xf32> to vector<8x1xf32>
    %26 = arith.addf %23, %25 : vector<8x1xf32>
    %c0_11 = arith.constant 0 : index
    %c0_12 = arith.constant 0 : index
    %27 = vector.load %arg6[%c0_11, %c0_12] : memref<8x1xf32, #tpu.memory_space<vmem>>, vector<8x1xf32>
    tpu.vector_store %arg6[%c0_11, %c0_12], %26 {strides = array<i32>} : memref<8x1xf32, #tpu.memory_space<vmem>>, vector<8x1xf32>,
    %c0_13 = arith.constant 0 : index
    %c0_14 = arith.constant 0 : index
    %28 = vector.load %arg5[%c0_13, %c0_14] : memref<8x1xf32, #tpu.memory_space<vmem>>, vector<8x1xf32>
    tpu.vector_store %arg5[%c0_13, %c0_14], %16 {strides = array<i32>} : memref<8x1xf32, #tpu.memory_space<vmem>>, vector<8x1xf32>,
    %29 = vector.broadcast %4 : vector<8x1xi32> to vector<8x32xi32>
    %30 = arith.cmpi eq, %8, %29 : vector<8x32xi32>
    %31 = arith.andi %10, %30 : vector<8x32xi1>
    %c0_15 = arith.constant 0 : index
    %c0_16 = arith.constant 0 : index
    %32 = vector.load %arg7[%c0_15, %c0_16] : memref<8x1xf32, #tpu.memory_space<vmem>>, vector<8x1xf32>
    %c0_i32_17 = arith.constant 0 : i32
    %33 = arith.sitofp %c0_i32_17 : i32 to f32
    %34 = vector.broadcast %33 : f32 to vector<8x32xf32>
    %35 = arith.select %31, %3, %34 : vector<8x32xi1>, vector<8x32xf32>
    %cst_18 = arith.constant dense<0.000000e+00> : vector<8xf32>
    %36 = vector.multi_reduction <add>, %35, %cst_18 [1] : vector<8x32xf32> to vector<8xf32>
    %37 = vector.shape_cast %36 : vector<8xf32> to vector<8x1xf32>
    %38 = arith.addf %32, %37 : vector<8x1xf32>
    %c0_19 = arith.constant 0 : index
    %c0_20 = arith.constant 0 : index
    %39 = vector.load %arg7[%c0_19, %c0_20] : memref<8x1xf32, #tpu.memory_space<vmem>>, vector<8x1xf32>
    tpu.vector_store %arg7[%c0_19, %c0_20], %38 {strides = array<i32>} : memref<8x1xf32, #tpu.memory_space<vmem>>, vector<8x1xf32>,
    %c0_i32_21 = arith.constant 0 : i32
    %40 = arith.cmpi eq, %arg1, %c0_i32_21 : i32
    %41 = arith.extui %40 : i1 to i32
    %c0_i32_22 = arith.constant 0 : i32
    %42 = arith.cmpi ne, %41, %c0_i32_22 : i32
    scf.if %42 {
      %c0_23 = arith.constant 0 : index
      %c0_24 = arith.constant 0 : index
      %43 = vector.load %arg5[%c0_23, %c0_24] : memref<8x1xf32, #tpu.memory_space<vmem>>, vector<8x1xf32>
      %c0_25 = arith.constant 0 : index
      %c0_26 = arith.constant 0 : index
      %44 = vector.load %arg6[%c0_25, %c0_26] : memref<8x1xf32, #tpu.memory_space<vmem>>, vector<8x1xf32>
      %45 = math.log %44 : vector<8x1xf32>
      %46 = arith.addf %43, %45 : vector<8x1xf32>
      %c0_27 = arith.constant 0 : index
      %c0_28 = arith.constant 0 : index
      %47 = vector.load %arg7[%c0_27, %c0_28] : memref<8x1xf32, #tpu.memory_space<vmem>>, vector<8x1xf32>
      %48 = arith.subf %46, %47 : vector<8x1xf32>
      %c0_29 = arith.constant 0 : index
      %c0_30 = arith.constant 0 : index
      %49 = vector.load %arg4[%c0_29, %c0_30] : memref<8x1xf32, #tpu.memory_space<vmem>>, vector<8x1xf32>
      tpu.vector_store %arg4[%c0_29, %c0_30], %48 {strides = array<i32>} : memref<8x1xf32, #tpu.memory_space<vmem>>, vector<8x1xf32>,
    } else {
    }
    return
  }
  func.func @transform_0(%arg0: i32, %arg1: i32) -> (i32, i32) {
    %c0_i32 = arith.constant 0 : i32
    %c0_i32_0 = arith.constant 0 : i32
    return %arg0, %c0_i32 : i32, i32
  }
  func.func @transform_1(%arg0: i32, %arg1: i32) -> (i32, i32) {
    %c0_i32 = arith.constant 0 : i32
    return %arg0, %arg1 : i32, i32
  }
  func.func @transform_2(%arg0: i32, %arg1: i32) -> (i32, i32) {
    %c0_i32 = arith.constant 0 : i32
    %c0_i32_0 = arith.constant 0 : i32
    return %arg0, %c0_i32 : i32, i32
  }
}

</mosaic_0001>

<bundles_post_ra>
// kernel: tpu_custom_call.1
= control target key start
LH: loop header
LB: loop body
LE: loop exit
PB: predicated region body
PF: predicated region fallthrough
CT: control target
= control target key end

     0   :  { %v22_v0 = vlaneseq  ;;  %vm15_vm0 = vcmask 7168   ;;  %v92_v1 = vmov -inf   ;;  %vm28_vm1 = vcmask 261120   ;;  %s131_s1 = inlined_call_operand.vmem [shape: f32[8,32], index: 1, kind: input, shape index: {}]   ;;  %s132_s0 = inlined_call_operand.vmem [shape: s32[8,1], index: 0, kind: input, shape index: {}]   ;;  %s133_s2 = inlined_call_operand.vmem [shape: f32[8,1], index: 2, kind: output, shape index: {}]  }
   0x1   :  { %16 = vst.msk [vmem:[#allocation2] sm:$0xff] %vm15_vm0, %v92_v1  ;;  %v19_v2 = vld [vmem:[%s131_s1] sm:$0xff]  ;;  %v93_v6 = vmov 0   ;;  %v94_v7 = vmov 0.0  }
   0x2   :  { %v23_v3 = vand.u32 127, %v22_v0  ;;  %84 = vset.pattern.permute.xlu0 %v93_v6  ;;  %85 = vset.pattern.permute.xlu1 %v93_v6  ;;  %17 = vst.msk [vmem:[#allocation3] sm:$0xff] %vm15_vm0, %v94_v7  ;;  %18 = vst.msk [vmem:[#allocation4] sm:$0xff] %vm15_vm0, %v94_v7  ;;  %v20_v8 = vld [vmem:[%s132_s0] sm:$0xff] }
   0x3   :  { %55 = vperm.xlu1 %85, %v20_v8  }
   0x4   :  { %vm26_vm2 = vcmp.lt.s32.totalorder %v23_v3, 32 }
   0x5   :  { %v27_v4 = vsel %vm26_vm2, %v19_v2, -inf }
   0x6   :  { %v29_v5 = vsel %vm28_vm1, %v27_v4, -inf }
   0x7   :  { %30 = vmax.xlane.f32.xlu0 %v29_v5 }
   0x8   :  { %v32_v9 = vld [vmem:[#allocation2] sm:$0xff] }
   0x9   :  { %v45_v23 = vld [vmem:[#allocation3] sm:$0xff]  ;;  %v59_v27 = vld [vmem:[#allocation4] sm:$0xff] }
  0x82   :  { %v56_v16 = vpop.permute.xlu1 %55 }
  0x83   :  { %vm57_vm3 = vcmp.eq.s32.totalorder %v23_v3, %v56_v16 }
  0x84   :  { %vm58_vm4 = vmand %vm26_vm2, %vm57_vm3 }
  0x85   :  { %v60_v18 = vsel %vm58_vm4, %v19_v2, 0.0 }
  0x86   :  { %v61_v20 = vsel %vm28_vm1, %v60_v18, 0.0 }
  0x94   :  { %v31_v10 = vpop.xlane.xlu0 %30 }
  0x95   :  { %v33_v11 = vmax.f32 %v32_v9, %v31_v10 }
  0x97   :  { %v42_v12 = vsub.f32 %v32_v9, %v33_v11  ;;  %53 = vst.msk [vmem:[#allocation2] sm:$0xff] %vm15_vm0, %v33_v11  ;;  %36 = vperm.xlu0 %84, %v33_v11  }
  0x99   :  { %v43_v21 = vmul.f32 1.442695, %v42_v12 }
  0x9e   :  { %v69_v33 = vld [vmem:[#allocation2] sm:$0xff] }
 0x116   :  { %v37_v13 = vpop.permute.xlu0 %36 }
 0x117   :  { %v39_v14 = vsub.f32 %v27_v4, %v37_v13 }
 0x119   :  { %v40_v15 = vmul.f32 1.442695, %v39_v14 }
 0x11b   :  { %86 = vpow2.f32 %v40_v15 }
 0x11c   :  { %88 = vpow2.f32 %v43_v21 }
 0x125   :  { %v87_v17 = vpop.eup %86 }
 0x126   :  { %v47_v19 = vsel %vm28_vm1, %v87_v17, 0.0  ;;  %v89_v22 = vpop.eup %88 }
 0x127   :  { %48 = vadd.xlane.f32.xlu1 %v47_v19  ;;  %v46_v24 = vmul.f32 %v89_v22, %v45_v23 }
 0x12b   :  { %62 = vadd.xlane.f32.xlu1 %v61_v20 }
 0x1b4   :  { %v49_v25 = vpop.xlane.xlu1 %48 }
 0x1b5   :  { %v50_v26 = vadd.f32 %v49_v25, %v46_v24 }
 0x1b7   :  { %52 = vst.msk [vmem:[#allocation3] sm:$0xff] %vm15_vm0, %v50_v26 }
 0x1b8   :  { %v63_v28 = vpop.xlane.xlu1 %62 }
 0x1b9   :  { %v64_v29 = vadd.f32 %v63_v28, %v59_v27 }
 0x1bb   :  { %65 = vst.msk [vmem:[#allocation4] sm:$0xff] %vm15_vm0, %v64_v29 }
 0x1be   :  { %v70_v30 = vld [vmem:[#allocation3] sm:$0xff] }
 0x1bf   :  { %90 = vlog2.f32 %v70_v30 }
 0x1c2   :  { %v74_v34 = vld [vmem:[#allocation4] sm:$0xff] }
 0x1c9   :  { %v91_v31 = vpop.eup %90 }
 0x1ca   :  { %v72_v32 = vmul.f32 0.6931472, %v91_v31 }
 0x1cc   :  { %v73_v35 = vadd.f32 %v72_v32, %v69_v33 }
 0x1ce   :  { %v75_v36 = vsub.f32 %v73_v35, %v74_v34 }
 0x1d0   :  { %76 = vst.msk [vmem:[%s133_s2] sm:$0xff] %vm15_vm0, %v75_v36 }

</bundles_post_ra>
